<compile_context>
chip_gen: v5e
topology: v5e:2x2
jax: 0.10.0
libtpu: 0.0.40
codegen_flags: <defaults>
</compile_context>

<pallas_src>
import functools

import jax
import jax.numpy as jnp
from jax.experimental import pallas as pl
from jax.experimental.pallas import tpu as pltpu

IN_W = 8    # 4 input features, zero-padded to 8 lanes
OUT_W = 8   # 3 action logits, zero-padded to 8 lanes


def _dqn_fused_kernel(x_ref, w1_ref, b1_ref, w2_ref, b2_ref, w3_ref, b3_ref,
                      w4_ref, b4_ref, o_ref, m_sc, s_sc, *, batch, block_b):
    p = pl.program_id(0)   # pass: 0 = online LSE stats, 1 = write normalized out
    i = pl.program_id(1)   # batch block

    @pl.when((p == 0) & (i == 0))
    def _init():
        m_sc[...] = jnp.full(m_sc.shape, -jnp.inf, m_sc.dtype)
        s_sc[...] = jnp.zeros(s_sc.shape, s_sc.dtype)

    x = x_ref[...]                                                 # (block_b, 8)

    # ---- all four layers on the MXU against VMEM-resident padded weights ----
    h = jnp.dot(x, w1_ref[...], preferred_element_type=jnp.float32) + b1_ref[...]
    h = jnp.maximum(h, 0.0)                                        # (block_b, 64)
    h = jnp.dot(h, w2_ref[...], preferred_element_type=jnp.float32) + b2_ref[...]
    h = jnp.maximum(h, 0.0)                                        # (block_b, 16)
    h = jnp.dot(h, w3_ref[...], preferred_element_type=jnp.float32) + b3_ref[...]
    h = jnp.maximum(h, 0.0)                                        # (block_b, 8)
    logits = (jnp.dot(h, w4_ref[...], preferred_element_type=jnp.float32)
              + b4_ref[...])                                       # (block_b, 8)

    @pl.when(p == 0)
    def _stats():
        # online column-wise (dim=0) max / sum-exp across batch blocks;
        # padded rows are masked to -inf.
        row = i * block_b + jax.lax.broadcasted_iota(jnp.int32, (block_b, 1), 0)
        masked = jnp.where(row < batch, logits, -jnp.inf)
        m_prev = m_sc[...]
        m_new = jnp.maximum(m_prev, jnp.max(masked, axis=0, keepdims=True))
        s_sc[...] = (s_sc[...] * jnp.exp(m_prev - m_new)
                     + jnp.sum(jnp.exp(masked - m_new), axis=0, keepdims=True))
        m_sc[...] = m_new
        o_ref[...] = logits        # deterministic filler; overwritten in pass 1

    @pl.when(p == 1)
    def _write():
        o_ref[...] = logits - (m_sc[...] + jnp.log(s_sc[...]))


def dqn_forward(x, padded_params, *, block_b=1024):
    """log_softmax(MLP(x), dim=0) — matches the PyTorch DQN forward (eval mode)."""
    w1, b1, w2, b2, w3, b3, w4, b4 = padded_params
    B = x.shape[0]
    # round block size to a multiple of 8 unconditionally (sublane rule)
    block_b = max(8, ((min(int(block_b), B) + 7) // 8) * 8)
    num_blocks = pl.cdiv(B, block_b)
    B_pad = num_blocks * block_b
    # pad batch rows to a block multiple and features 4 -> 8 in one shot
    x = jnp.pad(x, ((0, B_pad - B), (0, IN_W - x.shape[1])))

    def wspec(shape):   # resident operand: constant index map, DMA'd once
        return pl.BlockSpec(shape, lambda p, i: (0, 0))

    out = pl.pallas_call(
        functools.partial(_dqn_fused_kernel, batch=B, block_b=block_b),
        grid=(2, num_blocks),
        in_specs=[
            pl.BlockSpec((block_b, IN_W), lambda p, i: (i, 0)),   # x: streamed
            wspec((IN_W, 64)), wspec((1, 64)),                    # layer 1
            wspec((64, 16)),   wspec((1, 16)),                    # layer 2
            wspec((16, 8)),    wspec((1, 8)),                     # layer 3
            wspec((8, OUT_W)), wspec((1, OUT_W)),                 # layer 4
        ],
        out_specs=pl.BlockSpec((block_b, OUT_W), lambda p, i: (i, 0)),
        out_shape=jax.ShapeDtypeStruct((B_pad, OUT_W), jnp.float32),
        scratch_shapes=[pltpu.VMEM((1, OUT_W), jnp.float32),      # running max
                        pltpu.VMEM((1, OUT_W), jnp.float32)],     # running sum-exp
        compiler_params=pltpu.CompilerParams(
            # sequential: online dim=0 reduction + pass-0 -> pass-1 dependency
            dimension_semantics=("arbitrary", "arbitrary")),
    )(x, w1, b1, w2, b2, w3, b3, w4, b4)

    return out[:B, :3]


def init_linear(key, fan_in, fan_out):
    # PyTorch nn.Linear default init: U(-1/sqrt(fan_in), 1/sqrt(fan_in)).
    kw, kb = jax.random.split(key)
    bound = 1.0 / (fan_in ** 0.5)
    # stored as (in, out) so kernels compute x @ W  (transposed vs. PyTorch)
    w = jax.random.uniform(kw, (fan_in, fan_out), jnp.float32, -bound, bound)
    b = jax.random.uniform(kb, (fan_out,), jnp.float32, -bound, bound)
    return w, b


def pack_params(params):
    """Zero-pad the 4 layers to MXU/layout-friendly shapes."""
    w1, b1, w2, b2, w3, b3, w4, b4 = params
    w1p = jnp.zeros((IN_W, 64), jnp.float32).at[0:4, :].set(w1)     # K: 4 -> 8
    w4p = jnp.zeros((8, OUT_W), jnp.float32).at[:, 0:3].set(w4)     # N: 3 -> 8
    b4p = jnp.zeros((1, OUT_W), jnp.float32).at[0, 0:3].set(b4)
    return (w1p, b1.reshape(1, 64),
            w2, b2.reshape(1, 16),
            w3, b3.reshape(1, 8),
            w4p, b4p)


def reference_forward(x, params):
    w1, b1, w2, b2, w3, b3, w4, b4 = params
    h = jnp.maximum(x @ w1 + b1, 0.0)
    h = jnp.maximum(h @ w2 + b2, 0.0)
    h = jnp.maximum(h @ w3 + b3, 0.0)
    logits = h @ w4 + b4
    return jax.nn.log_softmax(logits, axis=0)   # dim=0, as in the PyTorch module


if __name__ == "__main__":
    key = jax.random.PRNGKey(0)
    k_x1, k_x2, k1, k2, k3, k4 = jax.random.split(key, 6)

    w1, b1 = init_linear(k1, 4, 64)
    w2, b2 = init_linear(k2, 64, 16)
    w3, b3 = init_linear(k3, 16, 8)
    w4, b4 = init_linear(k4, 8, 3)
    params = (w1, b1, w2, b2, w3, b3, w4, b4)
    padded = pack_params(params)

    # small batch (CartPole-style 4-dim observations), single block
    x_small = jax.random.normal(k_x1, (8, 4), jnp.float32)
    out_small = jax.block_until_ready(dqn_forward(x_small, padded))
    ref_small = reference_forward(x_small, params)
    assert out_small.shape == (8, 3)
    assert jnp.allclose(out_small, ref_small, atol=2e-5, rtol=1e-5)

    # larger batch exercising the multi-block grid, block rounding (100 -> 104),
    # padded-row masking and the fused two-pass online LSE
    x_big = jax.random.normal(k_x2, (300, 4), jnp.float32)
    out_big = jax.block_until_ready(dqn_forward(x_big, padded, block_b=100))
    ref_big = reference_forward(x_big, params)
    assert out_big.shape == (300, 3)
    assert jnp.allclose(out_big, ref_big, atol=2e-5, rtol=1e-5)

    print("KERNEL_OK")
</pallas_src>

<mosaic_0001>
module attributes {stable_mosaic.version = 11 : i64} {
  func.func @_dqn_fused_kernel(%arg0: i32, %arg1: i32, %arg2: memref<8x8xf32, #tpu.memory_space<vmem>>, %arg3: memref<8x64xf32, #tpu.memory_space<vmem>>, %arg4: memref<1x64xf32, #tpu.memory_space<vmem>>, %arg5: memref<64x16xf32, #tpu.memory_space<vmem>>, %arg6: memref<1x16xf32, #tpu.memory_space<vmem>>, %arg7: memref<16x8xf32, #tpu.memory_space<vmem>>, %arg8: memref<1x8xf32, #tpu.memory_space<vmem>>, %arg9: memref<8x8xf32, #tpu.memory_space<vmem>>, %arg10: memref<1x8xf32, #tpu.memory_space<vmem>>, %arg11: memref<8x8xf32, #tpu.memory_space<vmem>>, %arg12: memref<1x8xf32, #tpu.memory_space<vmem>>, %arg13: memref<1x8xf32, #tpu.memory_space<vmem>>) attributes {dimension_semantics = [#tpu.dimension_semantics<arbitrary>, #tpu.dimension_semantics<arbitrary>], iteration_bounds = array<i64: 2, 1>, scalar_prefetch = 0 : i64, scratch_operands = 2 : i64, tpu.core_type = #tpu.core_type<tc>, window_params = [{transform_indices = @transform_0, window_bounds = array<i64: 8, 8>}, {pipeline_mode = #tpu.pipeline_mode<synchronous>, transform_indices = @transform_1, window_bounds = array<i64: 8, 64>}, {pipeline_mode = #tpu.pipeline_mode<synchronous>, transform_indices = @transform_2, window_bounds = array<i64: 1, 64>}, {pipeline_mode = #tpu.pipeline_mode<synchronous>, transform_indices = @transform_3, window_bounds = array<i64: 64, 16>}, {pipeline_mode = #tpu.pipeline_mode<synchronous>, transform_indices = @transform_4, window_bounds = array<i64: 1, 16>}, {pipeline_mode = #tpu.pipeline_mode<synchronous>, transform_indices = @transform_5, window_bounds = array<i64: 16, 8>}, {pipeline_mode = #tpu.pipeline_mode<synchronous>, transform_indices = @transform_6, window_bounds = array<i64: 1, 8>}, {pipeline_mode = #tpu.pipeline_mode<synchronous>, transform_indices = @transform_7, window_bounds = array<i64: 8, 8>}, {pipeline_mode = #tpu.pipeline_mode<synchronous>, transform_indices = @transform_8, window_bounds = array<i64: 1, 8>}, {transform_indices = @transform_9, window_bounds = array<i64: 8, 8>}]} {
    %c0_i32 = arith.constant 0 : i32
    %0 = arith.cmpi eq, %arg0, %c0_i32 : i32
    %c0_i32_0 = arith.constant 0 : i32
    %1 = arith.cmpi eq, %arg1, %c0_i32_0 : i32
    %2 = arith.andi %0, %1 : i1
    %3 = arith.extui %2 : i1 to i32
    %c0_i32_1 = arith.constant 0 : i32
    %4 = arith.cmpi ne, %3, %c0_i32_1 : i32
    scf.if %4 {
      %cst_28 = arith.constant 0xFF800000 : f32
      %38 = vector.broadcast %cst_28 : f32 to vector<1x8xf32>
      %c0_29 = arith.constant 0 : index
      %c0_30 = arith.constant 0 : index
      %39 = vector.load %arg12[%c0_29, %c0_30] : memref<1x8xf32, #tpu.memory_space<vmem>>, vector<1x8xf32>
      tpu.vector_store %arg12[%c0_29, %c0_30], %38 {strides = array<i32>} : memref<1x8xf32, #tpu.memory_space<vmem>>, vector<1x8xf32>,
      %cst_31 = arith.constant 0.000000e+00 : f32
      %40 = vector.broadcast %cst_31 : f32 to vector<1x8xf32>
      %c0_32 = arith.constant 0 : index
      %c0_33 = arith.constant 0 : index
      %41 = vector.load %arg13[%c0_32, %c0_33] : memref<1x8xf32, #tpu.memory_space<vmem>>, vector<1x8xf32>
      tpu.vector_store %arg13[%c0_32, %c0_33], %40 {strides = array<i32>} : memref<1x8xf32, #tpu.memory_space<vmem>>, vector<1x8xf32>,
    } else {
    }
    %c0 = arith.constant 0 : index
    %c0_2 = arith.constant 0 : index
    %5 = vector.load %arg2[%c0, %c0_2] : memref<8x8xf32, #tpu.memory_space<vmem>>, vector<8x8xf32>
    %c0_3 = arith.constant 0 : index
    %c0_4 = arith.constant 0 : index
    %6 = vector.load %arg3[%c0_3, %c0_4] : memref<8x64xf32, #tpu.memory_space<vmem>>, vector<8x64xf32>
    %cst = arith.constant dense<0.000000e+00> : vector<8x64xf32>
    %7 = tpu.matmul %5, %6, %cst {dimension_numbers = #tpu.dot_dimension_numbers<[1], [0], [0], [1], [0, 0, 1, 1], [], []>} : vector<8x8xf32>, vector<8x64xf32>, vector<8x64xf32> -> vector<8x64xf32>
    %c0_5 = arith.constant 0 : index
    %c0_6 = arith.constant 0 : index
    %8 = vector.load %arg4[%c0_5, %c0_6] : memref<1x64xf32, #tpu.memory_space<vmem>>, vector<1x64xf32>
    %9 = vector.broadcast %8 : vector<1x64xf32> to vector<8x64xf32>
    %10 = arith.addf %7, %9 : vector<8x64xf32>
    %cst_7 = arith.constant 0.000000e+00 : f32
    %11 = vector.broadcast %cst_7 : f32 to vector<8x64xf32>
    %12 = arith.maximumf %10, %11 : vector<8x64xf32>
    %c0_8 = arith.constant 0 : index
    %c0_9 = arith.constant 0 : index
    %13 = vector.load %arg5[%c0_8, %c0_9] : memref<64x16xf32, #tpu.memory_space<vmem>>, vector<64x16xf32>
    %cst_10 = arith.constant dense<0.000000e+00> : vector<8x16xf32>
    %14 = tpu.matmul %12, %13, %cst_10 {dimension_numbers = #tpu.dot_dimension_numbers<[1], [0], [0], [1], [0, 0, 1, 1], [], []>} : vector<8x64xf32>, vector<64x16xf32>, vector<8x16xf32> -> vector<8x16xf32>
    %c0_11 = arith.constant 0 : index
    %c0_12 = arith.constant 0 : index
    %15 = vector.load %arg6[%c0_11, %c0_12] : memref<1x16xf32, #tpu.memory_space<vmem>>, vector<1x16xf32>
    %16 = vector.broadcast %15 : vector<1x16xf32> to vector<8x16xf32>
    %17 = arith.addf %14, %16 : vector<8x16xf32>
    %cst_13 = arith.constant 0.000000e+00 : f32
    %18 = vector.broadcast %cst_13 : f32 to vector<8x16xf32>
    %19 = arith.maximumf %17, %18 : vector<8x16xf32>
    %c0_14 = arith.constant 0 : index
    %c0_15 = arith.constant 0 : index
    %20 = vector.load %arg7[%c0_14, %c0_15] : memref<16x8xf32, #tpu.memory_space<vmem>>, vector<16x8xf32>
    %cst_16 = arith.constant dense<0.000000e+00> : vector<8x8xf32>
    %21 = tpu.matmul %19, %20, %cst_16 {dimension_numbers = #tpu.dot_dimension_numbers<[1], [0], [0], [1], [0, 0, 1, 1], [], []>} : vector<8x16xf32>, vector<16x8xf32>, vector<8x8xf32> -> vector<8x8xf32>
    %c0_17 = arith.constant 0 : index
    %c0_18 = arith.constant 0 : index
    %22 = vector.load %arg8[%c0_17, %c0_18] : memref<1x8xf32, #tpu.memory_space<vmem>>, vector<1x8xf32>
    %23 = vector.broadcast %22 : vector<1x8xf32> to vector<8x8xf32>
    %24 = arith.addf %21, %23 : vector<8x8xf32>
    %cst_19 = arith.constant 0.000000e+00 : f32
    %25 = vector.broadcast %cst_19 : f32 to vector<8x8xf32>
    %26 = arith.maximumf %24, %25 : vector<8x8xf32>
    %c0_20 = arith.constant 0 : index
    %c0_21 = arith.constant 0 : index
    %27 = vector.load %arg9[%c0_20, %c0_21] : memref<8x8xf32, #tpu.memory_space<vmem>>, vector<8x8xf32>
    %cst_22 = arith.constant dense<0.000000e+00> : vector<8x8xf32>
    %28 = tpu.matmul %26, %27, %cst_22 {dimension_numbers = #tpu.dot_dimension_numbers<[1], [0], [0], [1], [0, 0, 1, 1], [], []>} : vector<8x8xf32>, vector<8x8xf32>, vector<8x8xf32> -> vector<8x8xf32>
    %c0_23 = arith.constant 0 : index
    %c0_24 = arith.constant 0 : index
    %29 = vector.load %arg10[%c0_23, %c0_24] : memref<1x8xf32, #tpu.memory_space<vmem>>, vector<1x8xf32>
    %30 = vector.broadcast %29 : vector<1x8xf32> to vector<8x8xf32>
    %31 = arith.addf %28, %30 : vector<8x8xf32>
    %c0_i32_25 = arith.constant 0 : i32
    %32 = arith.cmpi eq, %arg0, %c0_i32_25 : i32
    %33 = arith.extui %32 : i1 to i32
    %c0_i32_26 = arith.constant 0 : i32
    %34 = arith.cmpi ne, %33, %c0_i32_26 : i32
    scf.if %34 {
      %c8_i32 = arith.constant 8 : i32
      %38 = arith.muli %arg1, %c8_i32 : i32
      %39 = tpu.iota {dimensions = array<i32: 0>} : vector<8x1xi32>
      %40 = vector.broadcast %38 : i32 to vector<8x1xi32>
      %41 = arith.addi %40, %39 : vector<8x1xi32>
      %c8_i32_28 = arith.constant 8 : i32
      %42 = vector.broadcast %c8_i32_28 : i32 to vector<8x1xi32>
      %43 = arith.cmpi slt, %41, %42 : vector<8x1xi32>
      %cst_29 = arith.constant 0xFF800000 : f32
      %44 = vector.shape_cast %43 : vector<8x1xi1> to vector<8x1xi1>
      %45 = vector.broadcast %44 : vector<8x1xi1> to vector<8x8xi1>
      %46 = vector.broadcast %cst_29 : f32 to vector<8x8xf32>
      %47 = arith.select %45, %31, %46 : vector<8x8xi1>, vector<8x8xf32>
      %c0_30 = arith.constant 0 : index
      %c0_31 = arith.constant 0 : index
      %48 = vector.load %arg12[%c0_30, %c0_31] : memref<1x8xf32, #tpu.memory_space<vmem>>, vector<1x8xf32>
      %cst_32 = arith.constant dense<0xFF800000> : vector<8xf32>
      %49 = vector.multi_reduction <maximumf>, %47, %cst_32 [0] : vector<8x8xf32> to vector<8xf32>
      %50 = vector.shape_cast %49 : vector<8xf32> to vector<1x8xf32>
      %51 = arith.maximumf %48, %50 : vector<1x8xf32>
      %c0_33 = arith.constant 0 : index
      %c0_34 = arith.constant 0 : index
      %52 = vector.load %arg13[%c0_33, %c0_34] : memref<1x8xf32, #tpu.memory_space<vmem>>, vector<1x8xf32>
      %53 = arith.subf %48, %51 : vector<1x8xf32>
      %54 = math.exp %53 : vector<1x8xf32>
      %55 = arith.mulf %52, %54 : vector<1x8xf32>
      %56 = vector.broadcast %51 : vector<1x8xf32> to vector<8x8xf32>
      %57 = arith.subf %47, %56 : vector<8x8xf32>
      %58 = math.exp %57 : vector<8x8xf32>
      %cst_35 = arith.constant dense<0.000000e+00> : vector<8xf32>
      %59 = vector.multi_reduction <add>, %58, %cst_35 [0] : vector<8x8xf32> to vector<8xf32>
      %60 = vector.shape_cast %59 : vector<8xf32> to vector<1x8xf32>
      %61 = arith.addf %55, %60 : vector<1x8xf32>
      %c0_36 = arith.constant 0 : index
      %c0_37 = arith.constant 0 : index
      %62 = vector.load %arg13[%c0_36, %c0_37] : memref<1x8xf32, #tpu.memory_space<vmem>>, vector<1x8xf32>
      tpu.vector_store %arg13[%c0_36, %c0_37], %61 {strides = array<i32>} : memref<1x8xf32, #tpu.memory_space<vmem>>, vector<1x8xf32>,
      %c0_38 = arith.constant 0 : index
      %c0_39 = arith.constant 0 : index
      %63 = vector.load %arg12[%c0_38, %c0_39] : memref<1x8xf32, #tpu.memory_space<vmem>>, vector<1x8xf32>
      tpu.vector_store %arg12[%c0_38, %c0_39], %51 {strides = array<i32>} : memref<1x8xf32, #tpu.memory_space<vmem>>, vector<1x8xf32>,
      %c0_40 = arith.constant 0 : index
      %c0_41 = arith.constant 0 : index
      %64 = vector.load %arg11[%c0_40, %c0_41] : memref<8x8xf32, #tpu.memory_space<vmem>>, vector<8x8xf32>
      tpu.vector_store %arg11[%c0_40, %c0_41], %31 {strides = array<i32>} : memref<8x8xf32, #tpu.memory_space<vmem>>, vector<8x8xf32>,
    } else {
    }
    %c1_i32 = arith.constant 1 : i32
    %35 = arith.cmpi eq, %arg0, %c1_i32 : i32
    %36 = arith.extui %35 : i1 to i32
    %c0_i32_27 = arith.constant 0 : i32
    %37 = arith.cmpi ne, %36, %c0_i32_27 : i32
    scf.if %37 {
      %c0_28 = arith.constant 0 : index
      %c0_29 = arith.constant 0 : index
      %38 = vector.load %arg12[%c0_28, %c0_29] : memref<1x8xf32, #tpu.memory_space<vmem>>, vector<1x8xf32>
      %c0_30 = arith.constant 0 : index
      %c0_31 = arith.constant 0 : index
      %39 = vector.load %arg13[%c0_30, %c0_31] : memref<1x8xf32, #tpu.memory_space<vmem>>, vector<1x8xf32>
      %40 = math.log %39 : vector<1x8xf32>
      %41 = arith.addf %38, %40 : vector<1x8xf32>
      %42 = vector.broadcast %41 : vector<1x8xf32> to vector<8x8xf32>
      %43 = arith.subf %31, %42 : vector<8x8xf32>
      %c0_32 = arith.constant 0 : index
      %c0_33 = arith.constant 0 : index
      %44 = vector.load %arg11[%c0_32, %c0_33] : memref<8x8xf32, #tpu.memory_space<vmem>>, vector<8x8xf32>
      tpu.vector_store %arg11[%c0_32, %c0_33], %43 {strides = array<i32>} : memref<8x8xf32, #tpu.memory_space<vmem>>, vector<8x8xf32>,
    } else {
    }
    return
  }
  func.func @transform_0(%arg0: i32, %arg1: i32) -> (i32, i32) {
    %c0_i32 = arith.constant 0 : i32
    %c0_i32_0 = arith.constant 0 : i32
    return %arg1, %c0_i32 : i32, i32
  }
  func.func @transform_1(%arg0: i32, %arg1: i32) -> (i32, i32) {
    %c0_i32 = arith.constant 0 : i32
    %c0_i32_0 = arith.constant 0 : i32
    %c0_i32_1 = arith.constant 0 : i32
    return %c0_i32, %c0_i32_0 : i32, i32
  }
  func.func @transform_2(%arg0: i32, %arg1: i32) -> (i32, i32) {
    %c0_i32 = arith.constant 0 : i32
    %c0_i32_0 = arith.constant 0 : i32
    %c0_i32_1 = arith.constant 0 : i32
    return %c0_i32, %c0_i32_0 : i32, i32
  }
  func.func @transform_3(%arg0: i32, %arg1: i32) -> (i32, i32) {
    %c0_i32 = arith.constant 0 : i32
    %c0_i32_0 = arith.constant 0 : i32
    %c0_i32_1 = arith.constant 0 : i32
    return %c0_i32, %c0_i32_0 : i32, i32
  }
  func.func @transform_4(%arg0: i32, %arg1: i32) -> (i32, i32) {
    %c0_i32 = arith.constant 0 : i32
    %c0_i32_0 = arith.constant 0 : i32
    %c0_i32_1 = arith.constant 0 : i32
    return %c0_i32, %c0_i32_0 : i32, i32
  }
  func.func @transform_5(%arg0: i32, %arg1: i32) -> (i32, i32) {
    %c0_i32 = arith.constant 0 : i32
    %c0_i32_0 = arith.constant 0 : i32
    %c0_i32_1 = arith.constant 0 : i32
    return %c0_i32, %c0_i32_0 : i32, i32
  }
  func.func @transform_6(%arg0: i32, %arg1: i32) -> (i32, i32) {
    %c0_i32 = arith.constant 0 : i32
    %c0_i32_0 = arith.constant 0 : i32
    %c0_i32_1 = arith.constant 0 : i32
    return %c0_i32, %c0_i32_0 : i32, i32
  }
  func.func @transform_7(%arg0: i32, %arg1: i32) -> (i32, i32) {
    %c0_i32 = arith.constant 0 : i32
    %c0_i32_0 = arith.constant 0 : i32
    %c0_i32_1 = arith.constant 0 : i32
    return %c0_i32, %c0_i32_0 : i32, i32
  }
  func.func @transform_8(%arg0: i32, %arg1: i32) -> (i32, i32) {
    %c0_i32 = arith.constant 0 : i32
    %c0_i32_0 = arith.constant 0 : i32
    %c0_i32_1 = arith.constant 0 : i32
    return %c0_i32, %c0_i32_0 : i32, i32
  }
  func.func @transform_9(%arg0: i32, %arg1: i32) -> (i32, i32) {
    %c0_i32 = arith.constant 0 : i32
    %c0_i32_0 = arith.constant 0 : i32
    return %arg1, %c0_i32 : i32, i32
  }
}

</mosaic_0001>

<bundles_post_ra>
// kernel: tpu_custom_call.1
= control target key start
LH: loop header
LB: loop body
LE: loop exit
PB: predicated region body
PF: predicated region fallthrough
CT: control target
= control target key end

     0   :  { %14 = vsyncpa [#allocation5], 0  ;;  %s759_s30 = smov 0   ;;  %s761_s10 = smov 0   ;;  %s856_s0 = inlined_call_operand.vmem [shape: f32[8,8], index: 0, kind: input, shape index: {}]   ;;  %s857_s1 = inlined_call_operand.vmem [shape: f32[8,64], index: 1, kind: input, shape index: {}]   ;;  %s858_s2 = inlined_call_operand.vmem [shape: f32[1,64], index: 2, kind: input, shape index: {}]   ;;  %s859_s3 = inlined_call_operand.vmem [shape: f32[64,16], index: 3, kind: input, shape index: {}]   ;;  %s860_s4 = inlined_call_operand.vmem [shape: f32[1,16], index: 4, kind: input, shape index: {}]   ;;  %s861_s5 = inlined_call_operand.vmem [shape: f32[16,8], index: 5, kind: input, shape index: {}]   ;;  %s862_s6 = inlined_call_operand.vmem [shape: f32[1,8], index: 6, kind: input, shape index: {}]   ;;  %s863_s7 = inlined_call_operand.vmem [shape: f32[8,8], index: 7, kind: input, shape index: {}]   ;;  %s864_s8 = inlined_call_operand.vmem [shape: f32[1,8], index: 8, kind: input, shape index: {}]   ;;  %s865_s9 = inlined_call_operand.hbm [shape: f32[8,8], index: 9, kind: output, shape index: {}]  }
   0x1   :  { %s763_s11 = smov 0  }
   0x2 LB: > { %s591_s12 = sadd.s32 4294967295, %s704_s11   ;;  %s32_s13 = sadd.s32 1, %s700_s10  ;;  %s704_s11 = sphi %s763_s11, %s20_s11   ;;  %s700_s10 = sphi %s761_s10, %s867_s10   ;;  %s696_s30 = sphi %s759_s30, %s866_s30  }
   0x3   : > { %p34_p0 = scmp.ge.s32.totalorder %s32_s13, 2  ;;  %p594_p1 = scmp.ge.s32.totalorder %s704_s11, 1 }
   0x4   : > { %p299_p2 = scmp.lt.s32.totalorder %s704_s11, 3 }
   0x5   : > { %s869_s13 = smov (%p34_p0, %s32_s13), 0 }
   0x6   : > { %p300_p3 = pnand %p594_p1, %p299_p2 }
   0x7   : > { %p333_p4 = scmp.eq.s32.totalorder (!%p300_p3), %s696_s30, 0 }
   0x8   : > { %303 = sbr.rel (%p300_p3) target bundleno = 624 (0x270), region = 56 }
   0xd   : > { %338 = sbr.rel (!%p333_p4) target bundleno = 18 (0x12), region = 60  ;;  %vm339_vm0 = vcmask (%p333_p4), 57344   ;;  %v706_v0 = vmov (%p333_p4), -inf   ;;  %v707_v1 = vmov (%p333_p4), 0.0  }
   0xe   : > { %340 = vst.msk [vmem:[#allocation2] sm:$0x1] (%p333_p4), %vm339_vm0, %v706_v0 }
   0xf   : > { %341 = vst.msk [vmem:[#allocation3] sm:$0x1] (%p333_p4), %vm339_vm0, %v707_v1 }
  0x12 PF: > { %v343_v2 = vld [vmem:[%s857_s1] sm:$0xff]  ;;  %vm348_vm1 = vcmask 64512   ;;  %v380_v4 = vld [vmem:[%s859_s3 + $0x38] sm:$0xff]  ;;  %v379_v5 = vld [vmem:[%s859_s3 + $0x30] sm:$0xff]  ;;  %vm385_vm2 = vcmask 523264   ;;  %vm416_vm3 = vcmask 130048  }
  0x13   : > { %v342_v3 = vld [vmem:[%s856_s0] sm:$0xff]  ;;  %367 = vmatpush.msra.mxu0 %v343_v2  ;;  %397 = vmatpush.msra.mxu1 %v380_v4  ;;  %v378_v6 = vld [vmem:[%s859_s3 + $0x28] sm:$0xff]  ;;  %v376_v8 = vld [vmem:[%s859_s3 + $0x18] sm:$0xff]  ;;  %p600_p5 = scmp.ne.s32.totalorder %s696_s30, 0 }
  0x14   : > { %596 = vmatmul.msk.f32.vlgmr.msra.gmra.mxu0 %vm348_vm1, %v342_v3  ;;  %v377_v7 = vld [vmem:[%s859_s3 + $0x20] sm:$0xff]  ;;  %v375_v9 = vld [vmem:[%s859_s3 + $0x10] sm:$0xff]  ;;  %v374_v10 = vld [vmem:[%s859_s3 + $0x8] sm:$0xff] }
  0x15   : > { %398 = vmatpush.msra.mxu1 %v379_v5  ;;  %v373_v11 = vld [vmem:[%s859_s3] sm:$0xff]  ;;  %v411_v16 = vld [vmem:[%s861_s5 + $0x8] sm:$0xff] }
  0x16   : > { %v640_v12 = vld [vmem:[%s858_s2] ss:$0 sm:$0xff]  ;;  %434 = vmatpush.msra.mxu2 %v411_v16 }
  0x17   : > { %399 = vmatpush.msra.mxu1 %v378_v6  ;;  %v410_v17 = vld [vmem:[%s861_s5] sm:$0xff] }
  0x18   : > { %435 = vmatpush.msra.mxu2 %v410_v17  ;;  %v641_v18 = vld [vmem:[%s860_s4] ss:$0 sm:$0xff] }
  0x19   : > { %400 = vmatpush.msra.mxu1 %v377_v7  ;;  %v441_v22 = vld [vmem:[%s863_s7] sm:$0xff] }
  0x1a   : > { %464 = vmatpush.msra.mxu3 %v441_v22  ;;  %v642_v23 = vld [vmem:[%s862_s6] ss:$0 sm:$0xff] }
  0x1b   : > { %401 = vmatpush.msra.mxu1 %v376_v8  ;;  %v643_v27 = vld [vmem:[%s864_s8] ss:$0 sm:$0xff] }
  0x1d   : > { %402 = vmatpush.msra.mxu1 %v375_v9 }
  0x1f   : > { %403 = vmatpush.msra.mxu1 %v374_v10 }
  0x21   : > { %404 = vmatpush.msra.mxu1 %v373_v11 }
  0x91   : > { %v369_v13 = vpop.f32.mrf.mxu0 }
  0x92   : > { %v370_v14 = vadd.f32 %v640_v12, %v369_v13 }
  0x94   : > { %v372_v15 = vmax.f32 %v370_v14, 0.0 }
  0x96   : > { %597 = vmatmul.msk.f32.vlgmr.msra.gmra.mxu1 %vm385_vm2, %v372_v15 }
 0x113   : > { %v406_v19 = vpop.f32.mrf.mxu1 }
 0x114   : > { %v407_v20 = vadd.f32 %v641_v18, %v406_v19 }
 0x116   : > { %v409_v21 = vmax.f32 %v407_v20, 0.0 }
 0x118   : > { %598 = vmatmul.msk.f32.vlgmr.msra.gmra.mxu2 %vm416_vm3, %v409_v21 }
 0x19b   : > { %v437_v24 = vpop.f32.mrf.mxu2 }
 0x19c   : > { %v438_v25 = vadd.f32 %v642_v23, %v437_v24 }
 0x19e   : > { %v440_v26 = vmax.f32 %v438_v25, 0.0 }
 0x1a0   : > { %599 = vmatmul.msk.f32.vlgmr.msra.gmra.mxu3 %vm348_vm1, %v440_v26 }
 0x220   : > { %471 = sbr.rel (%p600_p5) target bundleno = 594 (0x252), region = 64 }
 0x223   : > { %v466_v28 = vpop.f32.mrf.mxu3 }
 0x224   : > { %v467_v29 = vadd.f32 %v643_v27, %v466_v28 }
 0x225   : > { %v481_v36 = vld [vmem:[#allocation2] sm:$0x1]  ;;  %vm509_vm4 = vcmask 57344   ;;  %v490_v50 = vld [vmem:[#allocation3] sm:$0x1] }
 0x226   : > { %v482_v30 = vsel %vm348_vm1, %v467_v29, -inf  ;;  %512 = vst.msk [vmem:[#allocation4] sm:$0xff] %vm348_vm1, %v467_v29 }
 0x227   : > { %v483_v31 = vrot.slane %v482_v30, 4 }
 0x229   : > { %v484_v32 = vmax.f32 %v482_v30, %v483_v31 }
 0x22b   : > { %v485_v33 = vrot.slane %v484_v32, 2 }
 0x22d   : > { %v486_v34 = vmax.f32 %v484_v32, %v485_v33 }
 0x22f   : > { %v487_v35 = vrot.slane %v486_v34, 1 }
 0x231   : > { %v488_v37 = vmax.f32 %v486_v34, %v487_v35 }
 0x233   : > { %v489_v38 = vmax.f32 %v481_v36, %v488_v37 }
 0x235   : > { %v496_v39 = vperm.slane %v489_v38, 0  ;;  %511 = vst.msk [vmem:[#allocation2] sm:$0x1] %vm509_vm4, %v489_v38  ;;  %v491_v42 = vsub.f32 %v481_v36, %v489_v38 }
 0x237   : > { %v498_v40 = vsub.f32 %v467_v29, %v496_v39  ;;  %v492_v43 = vmul.f32 1.442695, %v491_v42 }
 0x239   : > { %v499_v41 = vmul.f32 1.442695, %v498_v40 }
 0x23b   : > { %644 = vpow2.f32 %v499_v41 }
 0x23c   : > { %646 = vpow2.f32 %v492_v43 }
 0x241   : > { %v645_v44 = vpop.eup %644 }
 0x242   : > { %v501_v45 = vsel %vm348_vm1, %v645_v44, 0.0  ;;  %v647_v49 = vpop.eup %646 }
 0x243   : > { %v502_v46 = vrot.slane %v501_v45, 4  ;;  %v494_v52 = vmul.f32 %v647_v49, %v490_v50 }
 0x245   : > { %v503_v47 = vadd.f32 %v502_v46, %v501_v45 }
 0x247   : > { %v504_v48 = vrot.slane %v503_v47, 2 }
 0x249   : > { %v505_v51 = vadd.f32 %v504_v48, %v503_v47 }
 0x24b   : > { %v506_v53 = vrot.slane %v505_v51, 1 }
 0x24d   : > { %v507_v54 = vadd.f32 %v506_v53, %v505_v51 }
 0x24f   : > { %v508_v55 = vadd.f32 %v507_v54, %v494_v52 }
 0x251   : > { %510 = vst.msk [vmem:[#allocation3] sm:$0x1] %vm509_vm4, %v508_v55 }
 0x252 PF: > { %p601_p6 = scmp.ne.s32.totalorder %s696_s30, 1 }
 0x254   : > { %516 = sbr.rel (%p601_p6) target bundleno = 618 (0x26a), region = 68 }
 0x259   : > { %v518_v56 = vld [vmem:[#allocation3] sm:$0x1]  ;;  %v517_v58 = vld [vmem:[#allocation2] sm:$0x1] }
 0x25a   : > { %648 = vlog2.f32 %v518_v56 }
 0x260   : > { %v649_v57 = vpop.eup %648 }
 0x261   : > { %v520_v59 = vmul.f32 0.6931472, %v649_v57 }
 0x263   : > { %v521_v60 = vadd.f32 %v520_v59, %v517_v58 }
 0x265   : > { %v523_v61 = vperm.slane %v521_v60, 0 }
 0x267   : > { %v525_v62 = vsub.f32 %v467_v29, %v523_v61 }
 0x269   : > { %526 = vst.msk [vmem:[#allocation4] sm:$0xff] %vm348_vm1, %v525_v62 }
 0x26a PF: > { %p611_p7 = scmp.eq.s32.totalorder %s591_s12, 1  ;;  %s537_s18 = sshll.u32 %s865_s9, 4  ;;  %s538_s18 = int_to_ptr.hbm [resolvable:$true] %s537_s18 }
 0x26b   : > { %s708_s30 = smov [#allocation4]  }
 0x26c   : > { %s535_s19 = sshll.u32 %s708_s30, 4  ;;  %s536_s19 = int_to_ptr.vmem [resolvable:$true] %s535_s19 }
 0x26d   : > { %608 = dma.vmem_to_hbm [thread:$0]  (%p611_p7), %s536_s19, 128, %s538_s18, [#allocation5]  }
 0x26e   : > { %691 = dma.done.wait (%p611_p7), [#allocation5], 128  }
 0x26f   : > { %693 = vsyncadd (%p611_p7), [#allocation5], 4294967168 }
 0x270 PF: > { %s20_s11 = sadd.s32 1, %s704_s11   ;;  %s866_s30 = smov %s700_s10 }
 0x271   : > { %p17_p8 = scmp.ge.s32.totalorder %s20_s11, 4   ;;  %s867_s10 = smov %s869_s13 }
 0x273   :  { %19 = sbr.rel (!%p17_p8) target bundleno = 2 (0x2), region = 96 }
 0x278   :  { %551 = vsyncpa [#allocation5], 1 }
 0x279   :  { %553 = vsyncpa [#allocation5 + $0x1], 1 }

</bundles_post_ra>
